<compile_context>
chip_gen: v7x
topology: tpu7x:2x2x1
jax: 0.10.0
libtpu: 0.0.40
codegen_flags: <defaults>
</compile_context>

<pallas_src>
import functools

import jax
import jax.numpy as jnp
from jax.experimental import pallas as pl
from jax.experimental.pallas import tpu as pltpu

NEG_SLOPE = 0.01  # nn.LeakyReLU default negative_slope


# ---------------------------------------------------------------------------
# Pallas kernel: one grid step = one row-tile of one image, ONE GEMM.
# ---------------------------------------------------------------------------
def _conv_lrelu_kernel(x_ref, w_ref, b_ref, o_ref, *, kh, stride, th):
    """x_ref: (1, Hp, Wp*Cin)       f32   haloed, (W,Cin)-flattened NHWC input
       w_ref: (kh*Wp*Cin, Wo*Cout)  bf16  lowered (Toeplitz) weight
       b_ref: (1, Wo*Cout)          f32   bias broadcast over W
       o_ref: (1, th, Wo*Cout)      f32   lane-dense, unpadded output row-tile
    """
    r = pl.program_id(1)
    rows_in = (th - 1) * stride + kh              # input rows feeding this tile
    row0 = r * (th * stride)
    if (th * stride) % 8 == 0:
        row0 = pl.multiple_of(row0, 8)            # sublane-aligned dynamic start
    xr = x_ref[0, pl.ds(row0, rows_in), :]        # (rows_in, Wp*Cin) f32

    # kh row-shifted slabs -> one (th, kh*Wp*Cin) patch. The lowered weight
    # already encodes the kw window and the W-stride, so this IS the im2col.
    # TODO(synk): for stride > 1, pre-split the padded input into stride-phase
    # planes in the wrapper so these slices stay contiguous instead of strided.
    hi = (th - 1) * stride + 1
    slabs = [xr[i:i + hi:stride, :] for i in range(kh)]
    patch = jnp.concatenate(slabs, axis=-1).astype(jnp.bfloat16)  # single cast

    # Single GEMM, f32 accumulation; bias + LeakyReLU as one epilogue pass.
    acc = jnp.dot(patch, w_ref[...], preferred_element_type=jnp.float32)
    acc = acc + b_ref[...]
    o_ref[0] = jnp.maximum(acc, NEG_SLOPE * acc).astype(o_ref.dtype)


# ---------------------------------------------------------------------------
# Wrapper: boundary-only layout glue + weight lowering
# ---------------------------------------------------------------------------
def _lower_weight(weight, Wp, Wo, stride):
    """(Cout, Cin, kh, kw) -> (kh*Wp*Cin, Wo*Cout) Toeplitz weight.

    W_low[(i*Wp + jp)*Cin + c, w*Cout + o] = weight[o, c, i, jp - w*stride]
    (zero where jp - w*stride is outside [0, kw)).  Folds the kw window and the
    W-direction stride into the single GEMM contraction.
    """
    Cout, Cin, kh, kw = weight.shape
    wt = jnp.transpose(weight, (2, 3, 1, 0))               # (kh, kw, Cin, Cout)
    jp = jnp.arange(Wp)[:, None]                           # (Wp, 1)
    wo = jnp.arange(Wo)[None, :]                           # (1, Wo)
    kk = jp - wo * stride                                  # (Wp, Wo)
    valid = (kk >= 0) & (kk < kw)
    w5 = wt[:, jnp.clip(kk, 0, kw - 1), :, :]              # (kh, Wp, Wo, Cin, Cout)
    w5 = jnp.where(valid[None, :, :, None, None], w5, 0.0)
    w5 = jnp.transpose(w5, (0, 1, 3, 2, 4))                # (kh, Wp, Cin, Wo, Cout)
    return w5.reshape(kh * Wp * Cin, Wo * Cout)


def leaky_relu_conv2d(x, weight, bias, *, stride, padding):
    """x: (N, Cin, H, W) f32, weight: (Cout, Cin, kh, kw), bias: (Cout,)
    returns (N, Cout, Ho, Wo) f32 (PyTorch NCHW semantics)."""
    N, Cin, H, W = x.shape
    Cout, _, kh, kw = weight.shape
    s, p = stride, padding
    Hp, Wp = H + 2 * p, W + 2 * p
    Ho = (Hp - kh) // s + 1
    Wo = (Wp - kw) // s + 1

    # Boundary-only NCHW -> NHWC, halo pad, flatten (W, Cin) into the lane axis
    # so the kernel never needs a minor-dims reshape.
    # TODO(synk): for large images, ingest NHWC at the module boundary and fuse
    # the halo via index_map + border masking instead of this extra XLA pad /
    # transpose pass over the input.
    xp = jnp.pad(jnp.transpose(x, (0, 2, 3, 1)),
                 ((0, 0), (p, p), (p, p), (0, 0)))
    xp = xp.reshape(N, Hp, Wp * Cin).astype(jnp.float32)

    # Lowered weight (bf16 stream) and W-broadcast bias (f32), built once.
    # TODO(synk): for large Cin*Cout or very wide images the lowered weight
    # (~kh*Wp*Cin*Wo*Cout elems) gets big -- switch back to per-offset
    # (kh*kw, Cin, Cout) weights with a K grid axis + f32 VMEM accumulator.
    w_low = _lower_weight(weight, Wp, Wo, s).astype(jnp.bfloat16)
    b_low = jnp.tile(bias, Wo).reshape(1, Wo * Cout).astype(jnp.float32)

    # Row tiling: >= 2 parallel row tiles keep both v7x TensorCores busy even
    # at N == 1; otherwise one whole image per step (v5e/v6e prefer few, large
    # steps to amortize the ~0.35us/step overhead).
    # TODO(synk): for large images derive th from a VMEM budget and set
    # vmem_limit_bytes explicitly (v7x has only 64 MiB physical VMEM).
    th = Ho // 2 if (Ho % 16 == 0) else Ho
    n_row_tiles = Ho // th

    kernel = functools.partial(_conv_lrelu_kernel, kh=kh, stride=s, th=th)

    out = pl.pallas_call(
        kernel,
        out_shape=jax.ShapeDtypeStruct((N, Ho, Wo * Cout), jnp.float32),
        grid_spec=pltpu.PrefetchScalarGridSpec(
            num_scalar_prefetch=0,
            grid=(N, n_row_tiles),
            in_specs=[
                pl.BlockSpec((1, Hp, Wp * Cin), lambda n, r: (n, 0, 0)),
                pl.BlockSpec((kh * Wp * Cin, Wo * Cout), lambda n, r: (0, 0)),
                pl.BlockSpec((1, Wo * Cout), lambda n, r: (0, 0)),
            ],
            out_specs=pl.BlockSpec((1, th, Wo * Cout), lambda n, r: (n, r, 0)),
        ),
        compiler_params=pltpu.CompilerParams(
            dimension_semantics=("parallel", "parallel")),
    )(xp, w_low, b_low)

    # True (unpadded) output; back to NCHW only at the module edge.
    out = out.reshape(N, Ho, Wo, Cout)
    return jnp.transpose(out, (0, 3, 1, 2))


def init_params(key, n_in, n_out, kernel_size):
    """Mirrors the module __init__: gaussian_weights_init -> weight ~ N(0,0.02);
    bias keeps Conv2d's default uniform(-1/sqrt(fan_in), 1/sqrt(fan_in))."""
    kw_key, kb_key = jax.random.split(key)
    weight = 0.02 * jax.random.normal(
        kw_key, (n_out, n_in, kernel_size, kernel_size), dtype=jnp.float32)
    fan_in = n_in * kernel_size * kernel_size
    bound = 1.0 / jnp.sqrt(jnp.float32(fan_in))
    bias = jax.random.uniform(
        kb_key, (n_out,), minval=-bound, maxval=bound, dtype=jnp.float32)
    return weight, bias


if __name__ == "__main__":
    # LeakyReLUConv2d(n_in=4, n_out=8, kernel_size=3, stride=1, padding=1)
    n_in, n_out, kernel_size, stride, padding = 4, 8, 3, 1, 1
    key = jax.random.PRNGKey(0)
    xkey, pkey = jax.random.split(key)

    x = jax.random.normal(xkey, (2, n_in, 16, 16), dtype=jnp.float32)
    weight, bias = init_params(pkey, n_in, n_out, kernel_size)

    fwd = jax.jit(functools.partial(
        leaky_relu_conv2d, stride=stride, padding=padding))
    out = jax.block_until_ready(fwd(x, weight, bias))

    # Reference: f32 lax conv + bias + LeakyReLU (module semantics). The kernel
    # rounds the patch/weight to bf16 (f32 accumulation), hence the tolerance.
    ref = jax.lax.conv_general_dilated(
        x, weight, window_strides=(stride, stride),
        padding=[(padding, padding), (padding, padding)],
        dimension_numbers=("NCHW", "OIHW", "NCHW"))
    ref = ref + bias.reshape(1, -1, 1, 1)
    ref = jnp.where(ref >= 0, ref, NEG_SLOPE * ref)

    assert out.shape == (2, n_out, 16, 16)
    assert jnp.allclose(out, ref, atol=2e-2, rtol=2e-2), (
        "max abs diff = %f" % float(jnp.max(jnp.abs(out - ref))))

    print("KERNEL_OK")
</pallas_src>

<mosaic_0001>
module attributes {stable_mosaic.version = 11 : i64} {
  func.func @_conv_lrelu_kernel(%arg0: i32, %arg1: i32, %arg2: memref<1x18x72xf32, #tpu.memory_space<vmem>>, %arg3: memref<216x128xbf16, #tpu.memory_space<vmem>>, %arg4: memref<1x128xf32, #tpu.memory_space<vmem>>, %arg5: memref<1x8x128xf32, #tpu.memory_space<vmem>>) attributes {dimension_semantics = [#tpu.dimension_semantics<parallel>, #tpu.dimension_semantics<parallel>], iteration_bounds = array<i64: 2, 2>, scalar_prefetch = 0 : i64, scratch_operands = 0 : i64, tpu.core_type = #tpu.core_type<tc>, window_params = [{transform_indices = @transform_0, window_bounds = array<i64: 1, 18, 72>}, {pipeline_mode = #tpu.pipeline_mode<synchronous>, transform_indices = @transform_1, window_bounds = array<i64: 216, 128>}, {pipeline_mode = #tpu.pipeline_mode<synchronous>, transform_indices = @transform_2, window_bounds = array<i64: 1, 128>}, {transform_indices = @transform_3, window_bounds = array<i64: 1, 8, 128>}]} {
    %c8_i32 = arith.constant 8 : i32
    %0 = arith.muli %arg1, %c8_i32 : i32
    %1 = tpu.assume_multiple %0, 8 : i32
    %c0 = arith.constant 0 : index
    %2 = arith.index_cast %1 : i32 to index
    %c0_0 = arith.constant 0 : index
    %3 = vector.load %arg2[%c0, %2, %c0_0] : memref<1x18x72xf32, #tpu.memory_space<vmem>>, vector<1x10x72xf32>
    %4 = vector.shape_cast %3 : vector<1x10x72xf32> to vector<10x72xf32>
    %5 = vector.extract_strided_slice %4 {offsets = [0, 0], sizes = [8, 72], strides = [1, 1]} : vector<10x72xf32> to vector<8x72xf32>
    %6 = vector.extract_strided_slice %4 {offsets = [1, 0], sizes = [8, 72], strides = [1, 1]} : vector<10x72xf32> to vector<8x72xf32>
    %7 = vector.extract_strided_slice %4 {offsets = [2, 0], sizes = [8, 72], strides = [1, 1]} : vector<10x72xf32> to vector<8x72xf32>
    %8 = tpu.concatenate %5, %6, %7 in 1 : vector<8x72xf32>, vector<8x72xf32>, vector<8x72xf32> -> vector<8x216xf32>
    %9 = arith.truncf %8 : vector<8x216xf32> to vector<8x216xbf16>
    %c0_1 = arith.constant 0 : index
    %c0_2 = arith.constant 0 : index
    %10 = vector.load %arg3[%c0_1, %c0_2] : memref<216x128xbf16, #tpu.memory_space<vmem>>, vector<216x128xbf16>
    %cst = arith.constant dense<0.000000e+00> : vector<8x128xf32>
    %11 = tpu.matmul %9, %10, %cst {dimension_numbers = #tpu.dot_dimension_numbers<[1], [0], [0], [1], [0, 0, 1, 1], [], []>} : vector<8x216xbf16>, vector<216x128xbf16>, vector<8x128xf32> -> vector<8x128xf32>
    %c0_3 = arith.constant 0 : index
    %c0_4 = arith.constant 0 : index
    %12 = vector.load %arg4[%c0_3, %c0_4] : memref<1x128xf32, #tpu.memory_space<vmem>>, vector<1x128xf32>
    %13 = vector.broadcast %12 : vector<1x128xf32> to vector<8x128xf32>
    %14 = arith.addf %11, %13 : vector<8x128xf32>
    %cst_5 = arith.constant 0.00999999977 : f32
    %15 = vector.broadcast %cst_5 : f32 to vector<8x128xf32>
    %16 = arith.mulf %15, %14 : vector<8x128xf32>
    %17 = arith.maximumf %14, %16 : vector<8x128xf32>
    %c0_6 = arith.constant 0 : index
    %c0_7 = arith.constant 0 : index
    %c0_8 = arith.constant 0 : index
    %18 = vector.load %arg5[%c0_6, %c0_7, %c0_8] : memref<1x8x128xf32, #tpu.memory_space<vmem>>, vector<1x8x128xf32>
    %19 = vector.shape_cast %18 : vector<1x8x128xf32> to vector<8x128xf32>
    %20 = vector.shape_cast %17 : vector<8x128xf32> to vector<1x8x128xf32>
    tpu.vector_store %arg5[%c0_6, %c0_7, %c0_8], %20 {strides = array<i32>} : memref<1x8x128xf32, #tpu.memory_space<vmem>>, vector<1x8x128xf32>,
    return
  }
  func.func @transform_0(%arg0: i32, %arg1: i32) -> (i32, i32, i32) {
    %c0_i32 = arith.constant 0 : i32
    %c0_i32_0 = arith.constant 0 : i32
    %c0_i32_1 = arith.constant 0 : i32
    return %arg0, %c0_i32, %c0_i32_0 : i32, i32, i32
  }
  func.func @transform_1(%arg0: i32, %arg1: i32) -> (i32, i32) {
    %c0_i32 = arith.constant 0 : i32
    %c0_i32_0 = arith.constant 0 : i32
    %c0_i32_1 = arith.constant 0 : i32
    return %c0_i32, %c0_i32_0 : i32, i32
  }
  func.func @transform_2(%arg0: i32, %arg1: i32) -> (i32, i32) {
    %c0_i32 = arith.constant 0 : i32
    %c0_i32_0 = arith.constant 0 : i32
    %c0_i32_1 = arith.constant 0 : i32
    return %c0_i32, %c0_i32_0 : i32, i32
  }
  func.func @transform_3(%arg0: i32, %arg1: i32) -> (i32, i32, i32) {
    %c0_i32 = arith.constant 0 : i32
    %c0_i32_0 = arith.constant 0 : i32
    return %arg0, %arg1, %c0_i32 : i32, i32, i32
  }
}

</mosaic_0001>

<bundles_post_ra>
// kernel: tile.8
= control target key start
LH: loop header
LB: loop body
LE: loop exit
PB: predicated region body
PF: predicated region fallthrough
CT: control target
= control target key end

     0   :  { %s28_s0 = inlined_call_operand.vmem [shape: f32[8], index: 0, kind: input, shape index: {}]   ;;  %s29_s1 = inlined_call_operand.vmem [shape: f32[16,8], index: 1, kind: output, shape index: {}]  }
   0x1   :  { %v4_v0 = vld [vmem:[%s28_s0] ss:$0 sm:$0xff] }
   0x2   :  { %5 = vst [vmem:[%s29_s1] sm:$0xff] %v4_v0  ;;  %8 = vst [vmem:[%s29_s1 + $0x8] sm:$0xff] %v4_v0 }

// kernel: tile.9
= control target key start
LH: loop header
LB: loop body
LE: loop exit
PB: predicated region body
PF: predicated region fallthrough
CT: control target
= control target key end

     0   :  { %s131_s10 = smov 120   ;;  %s132_s11 = smov 104   ;;  %vm3_vm0 = vcmask 64512   ;;  %vm9_vm1 = vcmask 1048512   ;;  %vm15_vm2 = vcmask 982912   ;;  %vm21_vm3 = vcmask 917312   ;;  %s207_s0 = inlined_call_operand.vmem [shape: f32[16,8], index: 0, kind: input, shape index: {}]   ;;  %s208_s1 = inlined_call_operand.vmem [shape: f32[1,128], index: 1, kind: output, shape index: {}]  }
   0x1   :  { %v101_v0 = vld [vmem:[%s207_s0 + $0xf] sm:$0x1]   ;;  %v103_v1 = vld [vmem:[%s207_s0 + $0xd] sm:$0x1]   ;;  %v102_v2 = vld [vmem:[%s207_s0 + $0xe] sm:$0x1]  }
   0x2   :  { %7 = vrot.lane.b32.xlu0 %v101_v0, %s131_s10  ;;  %19 = vrot.lane.b32.xlu1 %v103_v1, %s132_s11  ;;  %v104_v3 = vld [vmem:[%s207_s0 + $0xc] sm:$0x1]   ;;  %s133_s16 = smov 112   ;;  %s134_s17 = smov 96   ;;  %v105_v4 = vld [vmem:[%s207_s0 + $0xb] sm:$0x1]  }
   0x3   :  { %v106_v5 = vld [vmem:[%s207_s0 + $0xa] sm:$0x1]   ;;  %v2_v6 = vld [vmem:[%s207_s0] sm:$0x1]   ;;  %s135_s24 = smov 88   ;;  %s136_s25 = smov 80  }
   0x4   :  { %4 = vst.msk [vmem:[#allocation0] sm:$0x1] %vm3_vm0, %v2_v6   ;;  %v107_v7 = vld [vmem:[%s207_s0 + $0x9] sm:$0x1]   ;;  %v108_v8 = vld [vmem:[%s207_s0 + $0x8] sm:$0x1]  }
   0x5   :  { %s137_s30 = smov 72   ;;  %s138_s2 = smov 64   ;;  %v109_v9 = vld [vmem:[%s207_s0 + $0x7] sm:$0x1]   ;;  %v110_v10 = vld [vmem:[%s207_s0 + $0x6] sm:$0x1]  }
   0x6   :  { %13 = vrot.lane.b32.xlu0 %v102_v2, %s133_s16  ;;  %25 = vrot.lane.b32.xlu1 %v104_v3, %s134_s17  ;;  %s139_s7 = smov 56   ;;  %s140_s8 = smov 48   ;;  %v111_v11 = vld [vmem:[%s207_s0 + $0x5] sm:$0x1]   ;;  %v112_v12 = vld [vmem:[%s207_s0 + $0x4] sm:$0x1]  }
   0x7   :  { %s141_s13 = smov 40   ;;  %s142_s14 = smov 32   ;;  %v113_v13 = vld [vmem:[%s207_s0 + $0x3] sm:$0x1]   ;;  %v114_v14 = vld [vmem:[%s207_s0 + $0x2] sm:$0x1]  }
   0x8   :  { %s143_s19 = smov 24   ;;  %s144_s20 = smov 16   ;;  %v115_v15 = vld [vmem:[%s207_s0 + $0x1] sm:$0x1]   ;;  %vm27_vm4 = vcmask 851712   ;;  %vm33_vm5 = vcmask 786112  }
   0x9   :  { %s145_s0 = smov 8   ;;  %vm39_vm6 = vcmask 720512   ;;  %vm45_vm7 = vcmask 654912   ;;  %vm51_vm8 = vcmask 589312   ;;  %vm57_vm9 = vcmask 523712  }
   0xa   :  { %31 = vrot.lane.b32.xlu0 %v105_v4, %s135_s24  ;;  %37 = vrot.lane.b32.xlu1 %v106_v5, %s136_s25  ;;  %vm63_vm10 = vcmask 458112   ;;  %vm69_vm11 = vcmask 392512   ;;  %vm75_vm12 = vcmask 326912   ;;  %vm81_vm13 = vcmask 261312  }
   0xb   :  { %vm87_vm14 = vcmask 195712   ;;  %vm93_vm15 = vcmask 130112  }
   0xe   :  { %43 = vrot.lane.b32.xlu0 %v107_v7, %s137_s30  ;;  %49 = vrot.lane.b32.xlu1 %v108_v8, %s138_s2 }
  0x12   :  { %55 = vrot.lane.b32.xlu0 %v109_v9, %s139_s7  ;;  %61 = vrot.lane.b32.xlu1 %v110_v10, %s140_s8 }
  0x16   :  { %67 = vrot.lane.b32.xlu0 %v111_v11, %s141_s13  ;;  %73 = vrot.lane.b32.xlu1 %v112_v12, %s142_s14 }
  0x1a   :  { %79 = vrot.lane.b32.xlu0 %v113_v13, %s143_s19  ;;  %85 = vrot.lane.b32.xlu1 %v114_v14, %s144_s20 }
  0x1e   :  { %91 = vrot.lane.b32.xlu0 %v115_v15, %s145_s0 }
  0x74   :  { %v8_v16 = vpop.permute.xlu0 %7   ;;  %v20_v17 = vpop.permute.xlu1 %19  }
  0x75   :  { %10 = vst.msk [vmem:[#allocation0] sm:$0x1] %vm9_vm1, %v8_v16  }
  0x78   :  { %v14_v18 = vpop.permute.xlu0 %13   ;;  %v26_v19 = vpop.permute.xlu1 %25  }
  0x79   :  { %16 = vst.msk [vmem:[#allocation0] sm:$0x1] %vm15_vm2, %v14_v18  }
  0x7a   :  { %22 = vst.msk [vmem:[#allocation0] sm:$0x1] %vm21_vm3, %v20_v17  }
  0x7b   :  { %28 = vst.msk [vmem:[#allocation0] sm:$0x1] %vm27_vm4, %v26_v19  }
  0x7c   :  { %v32_v20 = vpop.permute.xlu0 %31   ;;  %v38_v21 = vpop.permute.xlu1 %37  }
  0x7d   :  { %34 = vst.msk [vmem:[#allocation0] sm:$0x1] %vm33_vm5, %v32_v20  }
  0x7e   :  { %40 = vst.msk [vmem:[#allocation0] sm:$0x1] %vm39_vm6, %v38_v21  }
  0x80   :  { %v44_v22 = vpop.permute.xlu0 %43   ;;  %v50_v23 = vpop.permute.xlu1 %49  }
  0x81   :  { %46 = vst.msk [vmem:[#allocation0] sm:$0x1] %vm45_vm7, %v44_v22  }
  0x82   :  { %52 = vst.msk [vmem:[#allocation0] sm:$0x1] %vm51_vm8, %v50_v23  }
  0x84   :  { %v56_v24 = vpop.permute.xlu0 %55   ;;  %v62_v25 = vpop.permute.xlu1 %61  }
  0x85   :  { %58 = vst.msk [vmem:[#allocation0] sm:$0x1] %vm57_vm9, %v56_v24  }
  0x86   :  { %64 = vst.msk [vmem:[#allocation0] sm:$0x1] %vm63_vm10, %v62_v25  }
  0x88   :  { %v68_v26 = vpop.permute.xlu0 %67   ;;  %v74_v27 = vpop.permute.xlu1 %73  }
  0x89   :  { %70 = vst.msk [vmem:[#allocation0] sm:$0x1] %vm69_vm11, %v68_v26  }
  0x8a   :  { %76 = vst.msk [vmem:[#allocation0] sm:$0x1] %vm75_vm12, %v74_v27  }
  0x8c   :  { %v80_v28 = vpop.permute.xlu0 %79   ;;  %v86_v29 = vpop.permute.xlu1 %85  }
  0x8d   :  { %82 = vst.msk [vmem:[#allocation0] sm:$0x1] %vm81_vm13, %v80_v28  }
  0x8e   :  { %88 = vst.msk [vmem:[#allocation0] sm:$0x1] %vm87_vm14, %v86_v29  }
  0x90   :  { %v92_v30 = vpop.permute.xlu0 %91  }
  0x91   :  { %94 = vst.msk [vmem:[#allocation0] sm:$0x1] %vm93_vm15, %v92_v30  }
  0x98   :  { %v98_v31 = vld [vmem:[#allocation0] sm:$0x1] }
  0x99   :  { %100 = vst [vmem:[%s208_s1] sm:$0x1] %v98_v31 }

// kernel: leaky_relu_conv2d.1
= control target key start
LH: loop header
LB: loop body
LE: loop exit
PB: predicated region body
PF: predicated region fallthrough
CT: control target
= control target key end

     0   :  { %s614_s12 = smov 0   ;;  %s616_s13 = smov 0   ;;  %s719_s0 = inlined_call_operand.vmem [shape: f32[2,18,72], index: 0, kind: input, shape index: {}]   ;;  %s720_s1 = inlined_call_operand.vmem [shape: bf16[216,128], index: 1, kind: input, shape index: {}]   ;;  %s721_s2 = inlined_call_operand.vmem [shape: f32[1,128], index: 2, kind: input, shape index: {}]   ;;  %s722_s3 = inlined_call_operand.vmem [shape: f32[2,16,128], index: 3, kind: output, shape index: {}]  }
   0x1   :  { %s618_s14 = smov 0   ;;  %s620_s15 = smov 0  }
   0x2   :  { %s622_s16 = smov 0  }
   0x3 LB: > { %s22_s17 = sadd.s32 1, %s581_s14  ;;  %s25_s18 = sadd.s32 1, %s585_s15  ;;  %s589_s16 = sphi %s622_s16, %s13_s16   ;;  %s585_s15 = sphi %s620_s15, %s726_s15   ;;  %s581_s14 = sphi %s618_s14, %s725_s14   ;;  %s577_s13 = sphi %s616_s13, %s724_s13   ;;  %s573_s12 = sphi %s614_s12, %s723_s12  }
   0x4   : > { %p23_p0 = scmp.ge.s32.totalorder %s22_s17, 2  ;;  %p470_p1 = scmp.ge.s32.totalorder %s589_s16, 1 }
   0x5   : > { %p151_p2 = scmp.lt.s32.totalorder %s589_s16, 5 }
   0x6   : > { %s728_s17 = smov (%p23_p0, %s22_s17), 0  ;;  %s730_s18 = smov (!%p23_p0, %s25_s18), %s585_s15 }
   0x7   : > { %p152_p3 = pnand %p470_p1, %p151_p2  ;;  %p27_p4 = scmp.ge.s32.totalorder %s730_s18, 2 }
   0x8   : > { %p178_p5 = scmp.lt.s32.totalorder (!%p152_p3), %s577_s13, 1  ;;  %v537_v0 = vld [vmem:[%s720_s1] sm:$0xff] (!%p152_p3)   ;;  %v591_v1 = vmov (!%p152_p3), 0   ;;  %v538_v2 = vld [vmem:[%s720_s1 + $0x8] sm:$0xff] (!%p152_p3)   ;;  %s474_s24 = sshll.u32 (!%p152_p3), %s573_s12, 3  ;;  %v539_v3 = vld [vmem:[%s720_s1 + $0x10] sm:$0xff] (!%p152_p3)  }
   0x9   : > { %s732_s18 = smov (%p27_p4, %s730_s18), 0  ;;  %155 = sbr.rel (%p152_p3) target bundleno = 367 (0x16f), region = 32 }
   0xa   : > { %341 = vmatprep.subr.bf16.mxu0 (!%p152_p3), %v591_v1  ;;  %vm198_vm0 = vcmask (!%p152_p3), 1046528   ;;  %vm205_vm1 = vcmask (!%p152_p3), 1045504   ;;  %v540_v10 = vld [vmem:[%s720_s1 + $0x18] sm:$0xff] (!%p152_p3)   ;;  %s592_s6 = smov (!%p152_p3), 72   ;;  %v541_v13 = vld [vmem:[%s720_s1 + $0x20] sm:$0xff] (!%p152_p3)   ;;  %s593_s9 = smov (!%p152_p3), 16  }
   0xb   : > { %342 = vmatpush1.bf16.msra.mxu0 (!%p152_p3), %v537_v0  ;;  %v542_v14 = vld [vmem:[%s720_s1 + $0x28] sm:$0xff] (!%p152_p3)   ;;  %v543_v15 = vld [vmem:[%s720_s1 + $0x30] sm:$0xff] (!%p152_p3)   ;;  %v544_v16 = vld [vmem:[%s720_s1 + $0x38] sm:$0xff] (!%p152_p3)   ;;  %vm337_vm2 = vcmask (!%p152_p3), 1043456   ;;  %vm212_vm3 = vcmask (!%p152_p3), 588800   ;;  %vm214_vm4 = vcmask (!%p152_p3), 130048  }
   0xc   : > { %343 = vmatprep.subr.bf16.mxu0 (!%p152_p3), %v591_v1  ;;  %v545_v17 = vld [vmem:[%s720_s1 + $0x40] sm:$0xff] (!%p152_p3)   ;;  %v546_v18 = vld [vmem:[%s720_s1 + $0x48] sm:$0xff] (!%p152_p3)   ;;  %v547_v19 = vld [vmem:[%s720_s1 + $0x50] sm:$0xff] (!%p152_p3)   ;;  %vm333_vm5 = vcmask (!%p152_p3), 719872   ;;  %p185_p6 = scmp.lt.s32.totalorder (!%p152_p3), %s573_s12, 1 }
   0xd   : > { %v548_v20 = vld [vmem:[%s720_s1 + $0x58] sm:$0xff] (!%p152_p3)   ;;  %v549_v21 = vld [vmem:[%s720_s1 + $0x60] sm:$0xff] (!%p152_p3)   ;;  %v550_v22 = vld [vmem:[%s720_s1 + $0x68] ss:$0 sps:$4 sm:$0xff] (!%p152_p3)  }
   0xe   : > { %v339_v23 = vsel (!%p152_p3), %vm337_vm2, %v550_v22, 0  ;;  %v475_v30 = vld [vmem:[%s721_s2] ss:$0 sm:$0xff] (!%p152_p3) }
   0xf   : > { %344 = vmatpush1.bf16.msra.mxu0 (!%p152_p3), %v538_v2 }
  0x10   : > { %s734_s13 = smov (!%p178_p5, %s577_s13), 1  ;;  %345 = vmatprep.subr.bf16.mxu0 %v591_v1  ;;  %s736_s12 = smov (!%p185_p6, %s573_s12), 1 }
  0x11   : > { %s493_s23 = smul.u32 24, %s734_s13  ;;  %s472_s8 = sshll.u32 %s734_s13, 1 }
  0x13   : > { %s182_s27 = scalar_lea.vmem %s719_s0, %s493_s23  ;;  %346 = vmatpush1.bf16.msra.mxu0 %v539_v3 }
  0x14   : > { %s193_s30 = scalar_lea.vmem %s182_s27, %s474_s24  ;;  %347 = vmatprep.subr.bf16.mxu0 %v591_v1 }
  0x15   : > { %v194_v4 = vld [vmem:[%s193_s30] sm:$0xff]  ;;  %v195_v5 = vld [vmem:[%s193_s30 + $0x8] sm:$0x3] }
  0x16   : > { %v199_v6 = vrot.slane %v194_v4, 1  ;;  %v200_v7 = vrot.slane %v195_v5, 1  ;;  %v206_v8 = vrot.slane %v194_v4, 2  ;;  %v207_v9 = vrot.slane %v195_v5, 2 }
  0x17   : > { %348 = vmatpush1.bf16.msra.mxu0 %v540_v10 }
  0x18   : > { %v201_v11 = vsel %vm198_vm0, %v199_v6, %v200_v7  ;;  %v208_v12 = vsel %vm205_vm1, %v206_v8, %v207_v9  ;;  %349 = vmatprep.subr.bf16.mxu0 %v591_v1 }
  0x19   : > { %202 = vrot.lane.b32.xlu0 %v201_v11, %s592_s6 }
  0x1b   : > { %350 = vmatpush1.bf16.msra.mxu0 %v541_v13 }
  0x1c   : > { %351 = vmatprep.subr.bf16.mxu0 %v591_v1 }
  0x1d   : > { %209 = vrot.lane.b32.xlu0 %v208_v12, %s593_s9  ;;  %s188_s9 = sadd.s32 %s472_s8, %s736_s12 }
  0x1e   : > { %s473_s19 = sshll.u32 %s188_s9, 3 }
  0x1f   : > { %352 = vmatpush1.bf16.msra.mxu0 %v542_v14  ;;  %s190_s22 = scalar_lea.vmem %s722_s3, %s473_s19 }
  0x20   : > { %353 = vmatprep.subr.bf16.mxu0 %v591_v1 }
  0x23   : > { %354 = vmatpush1.bf16.msra.mxu0 %v543_v15 }
  0x24   : > { %355 = vmatprep.subr.bf16.mxu0 %v591_v1 }
  0x27   : > { %356 = vmatpush1.bf16.msra.mxu0 %v544_v16 }
  0x28   : > { %357 = vmatprep.subr.bf16.mxu0 %v591_v1 }
  0x2b   : > { %358 = vmatpush1.bf16.msra.mxu0 %v545_v17 }
  0x2c   : > { %359 = vmatprep.subr.bf16.mxu0 %v591_v1 }
  0x2f   : > { %360 = vmatpush1.bf16.msra.mxu0 %v546_v18 }
  0x30   : > { %361 = vmatprep.subr.bf16.mxu0 %v591_v1 }
  0x33   : > { %362 = vmatpush1.bf16.msra.mxu0 %v547_v19 }
  0x34   : > { %363 = vmatprep.subr.bf16.mxu0 %v591_v1 }
  0x37   : > { %364 = vmatpush1.bf16.msra.mxu0 %v548_v20 }
  0x38   : > { %365 = vmatprep.subr.bf16.mxu0 %v591_v1 }
  0x3b   : > { %366 = vmatpush1.bf16.msra.mxu0 %v549_v21 }
  0x3c   : > { %367 = vmatprep.subr.bf16.mxu0 %v591_v1 }
  0x3f   : > { %368 = vmatpush1.bf16.msra.mxu0 %v339_v23 }
  0x8b   : > { %v203_v24 = vpop.permute.xlu0 %202 }
  0x8c   : > { %v213_v25 = vsel %vm212_vm3, %v194_v4, %v203_v24 }
  0x8d   : > { %v216_v29 = vpack.c.bf16 %v213_v25, %v213_v25 }
  0x8f   : > { %v210_v26 = vpop.permute.xlu0 %209 }
  0x90   : > { %v215_v27 = vsel %vm214_vm4, %v203_v24, %v210_v26 }
  0x91   : > { %v217_v28 = vpack.c.bf16 %v215_v27, %v215_v27 }
  0x93   : > { %490 = vmatprep.mubr.msk.bf16.mxu0 %vm333_vm5, %v217_v28 }
  0x94   : > { %374 = vmatmul.mubr.bf16.vlgmr.msra.gmra.mrb[0].mxu0 %v216_v29 }
 0x167   : > { %v375_v31 = vpop.f32.mrb[0].mxu0 }
 0x168   : > { %v376_v32 = vadd.f32 %v475_v30, %v375_v31  ;;  %v377_v33 = vpop.f32.mrb[1].mxu0 }
 0x169   : > { %v378_v34 = vpop.f32.mrb[2].mxu0 }
 0x16a   : > { %v381_v35 = vmul.f32 0.01, %v376_v32  ;;  %v379_v36 = vpop.f32.mrb[3].mxu0 }
 0x16c   : > { %v382_v37 = vmax.f32 %v376_v32, %v381_v35 }
 0x16e   : > { %383 = vst [vmem:[%s190_s22] sm:$0xff] %v382_v37 }
 0x16f PF: > { %s13_s16 = sadd.s32 1, %s589_s16   ;;  %s723_s12 = smov %s581_s14 }
 0x170   : > { %p10_p7 = scmp.ge.s32.totalorder %s13_s16, 6   ;;  %s724_s13 = smov %s585_s15 }
 0x171   : > { %s725_s14 = smov %s728_s17  ;;  %s726_s15 = smov %s732_s18 }
 0x172   :  { %12 = sbr.rel (!%p10_p7) target bundleno = 3 (0x3), region = 63 }

</bundles_post_ra>
